<compile_context>
chip_gen: v6e
topology: v6e:2x2x1
jax: 0.10.0
libtpu: 0.0.40
codegen_flags: <defaults>
</compile_context>

<pallas_src>
import functools

import jax
import jax.numpy as jnp
from jax.experimental import pallas as pl
from jax.experimental.pallas import tpu as pltpu


def _class_attn_kernel(x_ref, wq_ref, wkv_ref, wp_ref, bp_ref, s_ref, e_ref,
                       o_ref, *, scale):
    # x block: (TB, N, C); wq/wp: (C, C); wkv: (C, 2C); bp: (1, C)
    # s: (C, H) block-diagonal ones; e: (H, C) = s.T; o block: (TB, 1, C)
    x = x_ref[...]
    TB, N, C = x.shape

    # Fused K/V projection: one MXU pass over all TB*N rows, f32 accumulation.
    x_flat = x.reshape(TB * N, C)
    kv = jnp.dot(x_flat, wkv_ref[...], preferred_element_type=jnp.float32)
    k = kv[:, :C]                                    # (TB*N, C) f32
    v = kv[:, C:]                                    # (TB*N, C) f32

    # Q projection only for the class-token row of each batch element.
    # TODO(synk): PyTorch module supports qkv_bias=True; biases are omitted
    # here because the spec uses the default qkv_bias=False.
    x_cls = x[:, 0, :]                               # (TB, C)
    q = jnp.dot(x_cls, wq_ref[...],
                preferred_element_type=jnp.float32) * scale         # (TB, C)

    # Per-head logits: logits[b, n, h] = sum_d q[b, h*hd+d] * k[b, n, h*hd+d].
    # The segment-sum over head_dim is an MXU matmul against S (C, H).
    qk = q[:, None, :] * k.reshape(TB, N, C)         # (TB, N, C) f32
    logits = jnp.dot(qk.reshape(TB * N, C), s_ref[...],
                     preferred_element_type=jnp.float32)             # (TB*N, H)
    logits = logits.reshape(TB, N, -1)               # (TB, N, H)

    # Softmax over the sequence axis N, per batch / head, in f32.
    m = jnp.max(logits, axis=1, keepdims=True)       # (TB, 1, H)
    ex = jnp.exp(logits - m)                         # (TB, N, H)
    denom = jnp.sum(ex, axis=1, keepdims=True)       # (TB, 1, H)
    attn = ex / denom                                # (TB, N, H)
    # attn_drop is identity (p = 0.0)

    # Broadcast head weights back to channels (MXU matmul against E = S^T),
    # then take the weighted sum of v over N.
    attn_full = jnp.dot(attn.reshape(TB * N, -1), e_ref[...],
                        preferred_element_type=jnp.float32)           # (TB*N, C)
    av = attn_full * v                               # (TB*N, C)
    x_out = jnp.sum(av.reshape(TB, N, C), axis=1)    # (TB, C)

    # Output projection (with bias).  proj_drop is identity (p = 0.0).
    out = jnp.dot(x_out.astype(wp_ref.dtype), wp_ref[...],
                  preferred_element_type=jnp.float32) + bp_ref[...]   # (TB, C)
    o_ref[...] = out.reshape(TB, 1, C).astype(o_ref.dtype)


def _pick_batch_tile(B, target):
    """Largest divisor of B <= target, preferring a grid with >= 2 steps."""
    divisors = [d for d in range(1, min(target, B) + 1) if B % d == 0]
    multi = [d for d in divisors if B // d >= 2]
    return max(multi) if multi else max(divisors)


def class_attention(x, wq_t, wk_t, wv_t, wp_t, bp, *, num_heads,
                    compute_dtype=jnp.bfloat16, batch_tile=8):
    """x: (B, N, C); w*_t: (C, C) pre-transposed nn.Linear weights; bp: (1, C).

    compute_dtype: dtype of the matmul operands (bf16 = MXU fast path on
    v5e/v6e/v7x); accumulation and softmax stay f32.  Output keeps x.dtype.
    """
    B, N, C = x.shape
    H = num_heads
    head_dim = C // H
    scale = head_dim ** (-0.5)
    out_dtype = x.dtype

    if compute_dtype is None:
        compute_dtype = x.dtype

    tb = _pick_batch_tile(B, batch_tile)
    grid = (B // tb,)

    # Fused K/V weight; matmul operands in compute_dtype (the kernel requests
    # f32 accumulation via preferred_element_type).
    wkv_c = jnp.concatenate([wk_t, wv_t], axis=1).astype(compute_dtype)
    x_c = x.astype(compute_dtype)
    wq_c = wq_t.astype(compute_dtype)
    wp_c = wp_t.astype(compute_dtype)
    bp_f32 = bp.astype(jnp.float32)

    # Block-diagonal segment matrices, built once in the wrapper (hoisted out
    # of the grid): S[c, h] = 1 iff channel c belongs to head h; E = S^T.
    head_of_chan = jnp.arange(C, dtype=jnp.int32) // head_dim
    S = (head_of_chan[:, None] ==
         jnp.arange(H, dtype=jnp.int32)[None, :]).astype(jnp.float32)   # (C, H)
    E = S.T                                                             # (H, C)

    kernel = functools.partial(_class_attn_kernel, scale=scale)

    dsize = jnp.dtype(compute_dtype).itemsize
    flops = int(B * (4 * N * C * C          # fused K/V projection
                     + 2 * C * C            # q projection (class rows)
                     + 2 * C * C            # output projection
                     + 4 * N * C * H))      # segment-sum / broadcast matmuls
    transcendentals = int(B * N * H)        # softmax exp
    bytes_accessed = int(B * N * C * dsize              # x
                         + 4 * C * C * dsize            # wq + wkv + wp
                         + C * 4 + 2 * C * H * 4        # bias + S + E
                         + B * C * jnp.dtype(out_dtype).itemsize)   # out

    return pl.pallas_call(
        kernel,
        out_shape=jax.ShapeDtypeStruct((B, 1, C), out_dtype),
        grid_spec=pltpu.PrefetchScalarGridSpec(
            num_scalar_prefetch=0,
            grid=grid,
            in_specs=[
                pl.BlockSpec((tb, N, C), lambda b: (b, 0, 0)),   # x
                # TODO(synk): on v7x (64 MiB VMEM), the constant-index weight
                # specs could be single-buffered via pipeline_mode=pl.Buffered(1)
                # at large C to halve resident weight VMEM.
                pl.BlockSpec((C, C), lambda b: (0, 0)),          # Wq^T
                pl.BlockSpec((C, 2 * C), lambda b: (0, 0)),      # [Wk^T | Wv^T]
                pl.BlockSpec((C, C), lambda b: (0, 0)),          # Wproj^T
                pl.BlockSpec((1, C), lambda b: (0, 0)),          # proj bias
                pl.BlockSpec((C, H), lambda b: (0, 0)),          # S
                pl.BlockSpec((H, C), lambda b: (0, 0)),          # E = S^T
            ],
            out_specs=pl.BlockSpec((tb, 1, C), lambda b: (b, 0, 0)),
        ),
        compiler_params=pltpu.CompilerParams(
            dimension_semantics=("parallel",),
            vmem_limit_bytes=32 * 1024 * 1024),
        cost_estimate=pl.CostEstimate(
            flops=flops, transcendentals=transcendentals,
            bytes_accessed=bytes_accessed),
    )(x_c, wq_c, wkv_c, wp_c, bp_f32, S, E)


def class_attention_ref(x, wq_t, wk_t, wv_t, wp_t, bp, *, num_heads):
    """Pure-JAX reference mirroring the PyTorch forward."""
    B, N, C = x.shape
    hd = C // num_heads
    scale = hd ** (-0.5)
    q = (x[:, 0] @ wq_t).reshape(B, 1, num_heads, hd).transpose(0, 2, 1, 3)
    k = (x @ wk_t).reshape(B, N, num_heads, hd).transpose(0, 2, 1, 3)
    v = (x @ wv_t).reshape(B, N, num_heads, hd).transpose(0, 2, 1, 3)
    attn = (q * scale) @ jnp.swapaxes(k, -2, -1)
    attn = jax.nn.softmax(attn, axis=-1)
    x_cls = (attn @ v).transpose(0, 2, 1, 3).reshape(B, 1, C)
    return x_cls @ wp_t + bp[None]


if __name__ == "__main__":
    B, N, C = 8, 16, 64
    num_heads = 8

    key = jax.random.PRNGKey(0)
    kx, kq, kk, kv, kp, kb = jax.random.split(key, 6)

    x = jax.random.normal(kx, (B, N, C), dtype=jnp.float32)

    # Deterministic synthetic parameters (PyTorch Linear: weight (out, in),
    # y = x @ W^T + b).  We store the transposed weights directly.
    bound = 1.0 / (C ** 0.5)
    wq_t = jax.random.uniform(kq, (C, C), jnp.float32, -bound, bound)
    wk_t = jax.random.uniform(kk, (C, C), jnp.float32, -bound, bound)
    wv_t = jax.random.uniform(kv, (C, C), jnp.float32, -bound, bound)
    wp_t = jax.random.uniform(kp, (C, C), jnp.float32, -bound, bound)
    bp = jax.random.uniform(kb, (1, C), jnp.float32, -bound, bound)

    ref = class_attention_ref(x, wq_t, wk_t, wv_t, wp_t, bp,
                              num_heads=num_heads)

    # f32-operand path: tight correctness check against the reference.
    out_f32 = class_attention(x, wq_t, wk_t, wv_t, wp_t, bp,
                              num_heads=num_heads,
                              compute_dtype=jnp.float32)
    out_f32 = jax.block_until_ready(out_f32)
    assert out_f32.shape == (B, 1, C)
    assert jnp.allclose(out_f32, ref, atol=1e-4, rtol=1e-4), (
        f"f32 max err {jnp.max(jnp.abs(out_f32 - ref))}")

    # bf16-operand path (MXU fast path, f32 accumulation): looser tolerance.
    out_bf16 = class_attention(x, wq_t, wk_t, wv_t, wp_t, bp,
                               num_heads=num_heads,
                               compute_dtype=jnp.bfloat16)
    out_bf16 = jax.block_until_ready(out_bf16)
    assert out_bf16.shape == (B, 1, C)
    assert jnp.allclose(out_bf16.astype(jnp.float32), ref,
                        atol=5e-2, rtol=5e-2), (
        f"bf16 max err {jnp.max(jnp.abs(out_bf16.astype(jnp.float32) - ref))}")

    print("KERNEL_OK")
</pallas_src>

<mosaic_0001>
module attributes {stable_mosaic.version = 11 : i64} {
  func.func @_class_attn_kernel(%arg0: i32, %arg1: memref<4x16x64xf32, #tpu.memory_space<vmem>>, %arg2: memref<64x64xf32, #tpu.memory_space<vmem>>, %arg3: memref<64x128xf32, #tpu.memory_space<vmem>>, %arg4: memref<64x64xf32, #tpu.memory_space<vmem>>, %arg5: memref<1x64xf32, #tpu.memory_space<vmem>>, %arg6: memref<64x8xf32, #tpu.memory_space<vmem>>, %arg7: memref<8x64xf32, #tpu.memory_space<vmem>>, %arg8: memref<4x1x64xf32, #tpu.memory_space<vmem>>) attributes {dimension_semantics = [#tpu.dimension_semantics<parallel>], iteration_bounds = array<i64: 2>, scalar_prefetch = 0 : i64, scratch_operands = 0 : i64, tpu.core_type = #tpu.core_type<tc>, window_params = [{transform_indices = @transform_0, window_bounds = array<i64: 4, 16, 64>}, {pipeline_mode = #tpu.pipeline_mode<synchronous>, transform_indices = @transform_1, window_bounds = array<i64: 64, 64>}, {pipeline_mode = #tpu.pipeline_mode<synchronous>, transform_indices = @transform_2, window_bounds = array<i64: 64, 128>}, {pipeline_mode = #tpu.pipeline_mode<synchronous>, transform_indices = @transform_3, window_bounds = array<i64: 64, 64>}, {pipeline_mode = #tpu.pipeline_mode<synchronous>, transform_indices = @transform_4, window_bounds = array<i64: 1, 64>}, {pipeline_mode = #tpu.pipeline_mode<synchronous>, transform_indices = @transform_5, window_bounds = array<i64: 64, 8>}, {pipeline_mode = #tpu.pipeline_mode<synchronous>, transform_indices = @transform_6, window_bounds = array<i64: 8, 64>}, {transform_indices = @transform_7, window_bounds = array<i64: 4, 1, 64>}]} {
    %c0 = arith.constant 0 : index
    %c0_0 = arith.constant 0 : index
    %c0_1 = arith.constant 0 : index
    %0 = vector.load %arg1[%c0, %c0_0, %c0_1] : memref<4x16x64xf32, #tpu.memory_space<vmem>>, vector<4x16x64xf32>
    %1 = vector.shape_cast %0 : vector<4x16x64xf32> to vector<64x64xf32>
    %c0_2 = arith.constant 0 : index
    %c0_3 = arith.constant 0 : index
    %2 = vector.load %arg3[%c0_2, %c0_3] : memref<64x128xf32, #tpu.memory_space<vmem>>, vector<64x128xf32>
    %cst = arith.constant dense<0.000000e+00> : vector<64x128xf32>
    %3 = tpu.matmul %1, %2, %cst {dimension_numbers = #tpu.dot_dimension_numbers<[1], [0], [0], [1], [0, 0, 1, 1], [], []>} : vector<64x64xf32>, vector<64x128xf32>, vector<64x128xf32> -> vector<64x128xf32>
    %4 = vector.extract_strided_slice %3 {offsets = [0, 0], sizes = [64, 64], strides = [1, 1]} : vector<64x128xf32> to vector<64x64xf32>
    %5 = vector.extract_strided_slice %3 {offsets = [0, 64], sizes = [64, 64], strides = [1, 1]} : vector<64x128xf32> to vector<64x64xf32>
    %6 = vector.extract_strided_slice %0 {offsets = [0, 0, 0], sizes = [4, 1, 64], strides = [1, 1, 1]} : vector<4x16x64xf32> to vector<4x1x64xf32>
    %7 = vector.shape_cast %6 : vector<4x1x64xf32> to vector<4x64xf32>
    %c0_4 = arith.constant 0 : index
    %c0_5 = arith.constant 0 : index
    %8 = vector.load %arg2[%c0_4, %c0_5] : memref<64x64xf32, #tpu.memory_space<vmem>>, vector<64x64xf32>
    %cst_6 = arith.constant dense<0.000000e+00> : vector<4x64xf32>
    %9 = tpu.matmul %7, %8, %cst_6 {dimension_numbers = #tpu.dot_dimension_numbers<[1], [0], [0], [1], [0, 0, 1, 1], [], []>} : vector<4x64xf32>, vector<64x64xf32>, vector<4x64xf32> -> vector<4x64xf32>
    %cst_7 = arith.constant 0.353553385 : f32
    %10 = vector.broadcast %cst_7 : f32 to vector<4x64xf32>
    %11 = arith.mulf %9, %10 : vector<4x64xf32>
    %12 = vector.shape_cast %11 : vector<4x64xf32> to vector<4x1x64xf32>
    %13 = vector.shape_cast %4 : vector<64x64xf32> to vector<4x16x64xf32>
    %14 = vector.broadcast %12 : vector<4x1x64xf32> to vector<4x16x64xf32>
    %15 = arith.mulf %14, %13 : vector<4x16x64xf32>
    %16 = vector.shape_cast %15 : vector<4x16x64xf32> to vector<64x64xf32>
    %c0_8 = arith.constant 0 : index
    %c0_9 = arith.constant 0 : index
    %17 = vector.load %arg6[%c0_8, %c0_9] : memref<64x8xf32, #tpu.memory_space<vmem>>, vector<64x8xf32>
    %cst_10 = arith.constant dense<0.000000e+00> : vector<64x8xf32>
    %18 = tpu.matmul %16, %17, %cst_10 {dimension_numbers = #tpu.dot_dimension_numbers<[1], [0], [0], [1], [0, 0, 1, 1], [], []>} : vector<64x64xf32>, vector<64x8xf32>, vector<64x8xf32> -> vector<64x8xf32>
    %19 = vector.shape_cast %18 : vector<64x8xf32> to vector<4x16x8xf32>
    %cst_11 = arith.constant dense<0xFF800000> : vector<4x8xf32>
    %20 = vector.multi_reduction <maximumf>, %19, %cst_11 [1] : vector<4x16x8xf32> to vector<4x8xf32>
    %21 = vector.shape_cast %20 : vector<4x8xf32> to vector<4x1x8xf32>
    %22 = vector.broadcast %21 : vector<4x1x8xf32> to vector<4x16x8xf32>
    %23 = arith.subf %19, %22 : vector<4x16x8xf32>
    %24 = math.exp %23 : vector<4x16x8xf32>
    %cst_12 = arith.constant dense<0.000000e+00> : vector<4x8xf32>
    %25 = vector.multi_reduction <add>, %24, %cst_12 [1] : vector<4x16x8xf32> to vector<4x8xf32>
    %26 = vector.shape_cast %25 : vector<4x8xf32> to vector<4x1x8xf32>
    %27 = vector.broadcast %26 : vector<4x1x8xf32> to vector<4x16x8xf32>
    %28 = arith.divf %24, %27 : vector<4x16x8xf32>
    %29 = vector.shape_cast %28 : vector<4x16x8xf32> to vector<64x8xf32>
    %c0_13 = arith.constant 0 : index
    %c0_14 = arith.constant 0 : index
    %30 = vector.load %arg7[%c0_13, %c0_14] : memref<8x64xf32, #tpu.memory_space<vmem>>, vector<8x64xf32>
    %cst_15 = arith.constant dense<0.000000e+00> : vector<64x64xf32>
    %31 = tpu.matmul %29, %30, %cst_15 {dimension_numbers = #tpu.dot_dimension_numbers<[1], [0], [0], [1], [0, 0, 1, 1], [], []>} : vector<64x8xf32>, vector<8x64xf32>, vector<64x64xf32> -> vector<64x64xf32>
    %32 = arith.mulf %31, %5 : vector<64x64xf32>
    %33 = vector.shape_cast %32 : vector<64x64xf32> to vector<4x16x64xf32>
    %cst_16 = arith.constant dense<0.000000e+00> : vector<4x64xf32>
    %34 = vector.multi_reduction <add>, %33, %cst_16 [1] : vector<4x16x64xf32> to vector<4x64xf32>
    %c0_17 = arith.constant 0 : index
    %c0_18 = arith.constant 0 : index
    %35 = vector.load %arg4[%c0_17, %c0_18] : memref<64x64xf32, #tpu.memory_space<vmem>>, vector<64x64xf32>
    %cst_19 = arith.constant dense<0.000000e+00> : vector<4x64xf32>
    %36 = tpu.matmul %34, %35, %cst_19 {dimension_numbers = #tpu.dot_dimension_numbers<[1], [0], [0], [1], [0, 0, 1, 1], [], []>} : vector<4x64xf32>, vector<64x64xf32>, vector<4x64xf32> -> vector<4x64xf32>
    %c0_20 = arith.constant 0 : index
    %c0_21 = arith.constant 0 : index
    %37 = vector.load %arg5[%c0_20, %c0_21] : memref<1x64xf32, #tpu.memory_space<vmem>>, vector<1x64xf32>
    %38 = vector.broadcast %37 : vector<1x64xf32> to vector<4x64xf32>
    %39 = arith.addf %36, %38 : vector<4x64xf32>
    %40 = vector.shape_cast %39 : vector<4x64xf32> to vector<4x1x64xf32>
    %c0_22 = arith.constant 0 : index
    %c0_23 = arith.constant 0 : index
    %c0_24 = arith.constant 0 : index
    %41 = vector.load %arg8[%c0_22, %c0_23, %c0_24] : memref<4x1x64xf32, #tpu.memory_space<vmem>>, vector<4x1x64xf32>
    tpu.vector_store %arg8[%c0_22, %c0_23, %c0_24], %40 {strides = array<i32>} : memref<4x1x64xf32, #tpu.memory_space<vmem>>, vector<4x1x64xf32>,
    return
  }
  func.func @transform_0(%arg0: i32) -> (i32, i32, i32) {
    %c0_i32 = arith.constant 0 : i32
    %c0_i32_0 = arith.constant 0 : i32
    %c0_i32_1 = arith.constant 0 : i32
    return %arg0, %c0_i32, %c0_i32_0 : i32, i32, i32
  }
  func.func @transform_1(%arg0: i32) -> (i32, i32) {
    %c0_i32 = arith.constant 0 : i32
    %c0_i32_0 = arith.constant 0 : i32
    %c0_i32_1 = arith.constant 0 : i32
    return %c0_i32, %c0_i32_0 : i32, i32
  }
  func.func @transform_2(%arg0: i32) -> (i32, i32) {
    %c0_i32 = arith.constant 0 : i32
    %c0_i32_0 = arith.constant 0 : i32
    %c0_i32_1 = arith.constant 0 : i32
    return %c0_i32, %c0_i32_0 : i32, i32
  }
  func.func @transform_3(%arg0: i32) -> (i32, i32) {
    %c0_i32 = arith.constant 0 : i32
    %c0_i32_0 = arith.constant 0 : i32
    %c0_i32_1 = arith.constant 0 : i32
    return %c0_i32, %c0_i32_0 : i32, i32
  }
  func.func @transform_4(%arg0: i32) -> (i32, i32) {
    %c0_i32 = arith.constant 0 : i32
    %c0_i32_0 = arith.constant 0 : i32
    %c0_i32_1 = arith.constant 0 : i32
    return %c0_i32, %c0_i32_0 : i32, i32
  }
  func.func @transform_5(%arg0: i32) -> (i32, i32) {
    %c0_i32 = arith.constant 0 : i32
    %c0_i32_0 = arith.constant 0 : i32
    %c0_i32_1 = arith.constant 0 : i32
    return %c0_i32, %c0_i32_0 : i32, i32
  }
  func.func @transform_6(%arg0: i32) -> (i32, i32) {
    %c0_i32 = arith.constant 0 : i32
    %c0_i32_0 = arith.constant 0 : i32
    %c0_i32_1 = arith.constant 0 : i32
    return %c0_i32, %c0_i32_0 : i32, i32
  }
  func.func @transform_7(%arg0: i32) -> (i32, i32, i32) {
    %c0_i32 = arith.constant 0 : i32
    %c0_i32_0 = arith.constant 0 : i32
    %c0_i32_1 = arith.constant 0 : i32
    return %arg0, %c0_i32, %c0_i32_0 : i32, i32, i32
  }
}

</mosaic_0001>

<bundles_post_ra>
// kernel: tpu_custom_call.1
= control target key start
LH: loop header
LB: loop body
LE: loop exit
PB: predicated region body
PF: predicated region fallthrough
CT: control target
= control target key end

     0   :  { %s2175_s0 = inlined_call_operand.hbm [shape: f32[8,16,64], index: 0, kind: input, shape index: {}]   ;;  %s2176_s1 = inlined_call_operand.vmem [shape: f32[64,64], index: 1, kind: input, shape index: {}]   ;;  %s2177_s2 = inlined_call_operand.hbm [shape: f32[64,128], index: 2, kind: input, shape index: {}]   ;;  %s2178_s3 = inlined_call_operand.hbm [shape: f32[64,64], index: 3, kind: input, shape index: {}]   ;;  %s2179_s4 = inlined_call_operand.vmem [shape: f32[1,64], index: 4, kind: input, shape index: {}]   ;;  %s2180_s5 = inlined_call_operand.vmem [shape: f32[64,8], index: 5, kind: input, shape index: {}]   ;;  %s2181_s6 = inlined_call_operand.vmem [shape: f32[8,64], index: 6, kind: input, shape index: {}]   ;;  %s2182_s7 = inlined_call_operand.hbm [shape: f32[8,1,64], index: 7, kind: output, shape index: {}]  }
   0x1   :  { %2189 = sst [smem:[#allocation12_spill]] %s2177_s2 }
   0x2   :  { %12 = vsyncpa [#allocation3], 0 }
   0x3   :  { %14 = vsyncpa [#allocation3 + $0x1], 0 }
   0x4   :  { %15 = vsyncpa [#allocation6], 0 }
   0x5   :  { %16 = vsyncpa [#allocation4], 0 }
   0x6   :  { %18 = vsyncpa [#allocation4 + $0x1], 0  ;;  %s1821_s24 = smov 0   ;;  %s1823_s25 = smov 0  }
   0x7   :  { %s1825_s26 = smov 0   ;;  %s1827_s27 = smov 0  }
   0x8 LB: > { %s1842_s28 = sadd.s32 4294967295, %s1767_s27   ;;  %s1304_s29 = sadd.s32 4294967294, %s1767_s27   ;;  %s1767_s27 = sphi %s1827_s27, %s2209_s27   ;;  %s1763_s26 = sphi %s1825_s26, %s2208_s26   ;;  %s1759_s25 = sphi %s1823_s25, %s2207_s25   ;;  %s1755_s24 = sphi %s1821_s24, %s2206_s24  }
   0x9   : > { %p44_p0 = scmp.ne.s32.totalorder %s1759_s25, %s1755_s24  ;;  %p2184_p1 = scmp.eq.s32.totalorder %s1842_s28, 0 }
   0xa   : > { %p194_p2 = scmp.eq.s32.totalorder %s1842_s28, 1  ;;  %p200_p3 = scmp.eq.s32.totalorder %s1304_s29, 1 }
   0xb   : > { %p1851_p4 = por %p2184_p1, %p44_p0  ;;  %p1305_p5 = scmp.ge.s32.totalorder %s1767_s27, 1 }
   0xc   : > { %p1856_p6 = por %p200_p3, %p44_p0  ;;  %p207_p7 = scmp.lt.s32.totalorder %s1767_s27, 3 }
   0xd   : > { %s2190_s30 = scalar_select %p1851_p4, 1, 0 }
   0xe   : > { %s2191_s8 = scalar_select %p1856_p6, 1, 0 }
   0xf   : > { %p1861_p8 = pnand %p1305_p5, %p207_p7  ;;  %s1769_s10 = smov [#allocation5]  }
  0x10   : > { %s222_s11 = sshll.u32 %s1769_s10, 4  ;;  %s1770_s13 = smov [#allocation7]   ;;  %s223_s11 = int_to_ptr.vmem [resolvable:$true] %s222_s11 }
  0x11   : > { %s2192_s9 = scalar_select %p1861_p8, 1, 0 }
  0x12   : > { %p1532_p9 = pneg %p1861_p8  ;;  %s235_s14 = sshll.u32 %s1770_s13, 4  ;;  %s236_s14 = int_to_ptr.vmem [resolvable:$true] %s235_s14 }
  0x13   : > { %s1630_s15 = scalar_lea.vmem %s223_s11, 1024  ;;  %p1638_p5 = scmp.lt.s32.totalorder %s223_s11, %s223_s11 }
  0x14   : > { %p1870_p11 = pnand %p1532_p9, %p2184_p1  ;;  %p1631_p13 = scmp.ne.s32.totalorder %s223_s11, %s1630_s15 }
  0x15   : > { %p1639_p7 = scmp.lt.s32.totalorder %s1630_s15, %s1630_s15 }
  0x16   : > { %p1621_p12 = pneg %p1870_p11 }
  0x17   : > { %p1640_p10 = por %p1639_p7, %p1638_p5 }
  0x18   : > { %p1633_p0 = pnand %p1631_p13, %p1621_p12 }
  0x1a   : > { %p1634_p3 = pneg %p1633_p0 }
  0x1c   : > { %p1641_p9 = pnand %p1640_p10, %p1634_p3 }
  0x1e   : > { %1644 = shalt.err (!%p1641_p9)
}
  0x1f   : > { %s2183_s16 = smov 128   ;;  %s2185_s17 = smov 8  }
  0x20   : > { %s2194_s2 = sld [smem:[#allocation12_spill]]  ;;  %s1656_s20 = scalar_lea.vmem %s236_s14, 1024 }
  0x21   : > { %p1657_p13 = scmp.ne.s32.totalorder %s236_s14, %s1656_s20  ;;  %p1664_p10 = scmp.lt.s32.totalorder %s236_s14, %s236_s14 }
  0x22   : > { %p1665_p3 = scmp.lt.s32.totalorder %s1656_s20, %s1656_s20 }
  0x23   : > { %p1659_p0 = pnand %p1657_p13, %p1621_p12 }
  0x24   : > { %p1666_p7 = por %p1665_p3, %p1664_p10 }
  0x25   : > { %p1660_p5 = pneg %p1659_p0 }
  0x26   : > { %1535 = dma.hbm_to_vmem [thread:$0]  (!%p1870_p11), %s2194_s2, 1024, %s223_s11, [#allocation6], %s2183_s16, %s2183_s16, %s2185_s17  }
  0x27   : > { %p1667_p9 = pnand %p1666_p7, %p1660_p5 }
  0x29   : > { %1670 = shalt.err (!%p1667_p9)
}
  0x2a   : > { %1538 = dma.hbm_to_vmem [thread:$0]  (!%p1870_p11), %s2178_s3, 1024, %s236_s14, [#allocation6], %s2183_s16, %s2183_s16, %s2185_s17  }
  0x2b   : > { %s1899_s23 = sadd.s32 1, %s1767_s27   ;;  %s31_s29 = sadd.s32 1, %s1763_s26 }
  0x2c   : > { %s28_s10 = ssub.s32 %s1767_s27, %s1899_s23  ;;  %p38_p12 = scmp.ne.s32.totalorder %s1763_s26, %s1759_s25 }
  0x2d   : > { %p29_p13 = scmp.eq.s32.totalorder %s28_s10, 0  ;;  %p39_p0 = scmp.eq.s32.totalorder %s1767_s27, 0 }
  0x2e   : > { %p1909_p5 = por %p194_p2, %p38_p12  ;;  %p1549_p10 = scmp.lt.s32.totalorder %s1767_s27, 2 }
  0x2f   : > { %s1915_s12 = scalar_select %p29_p13, %s1763_s26, %s31_s29  }
  0x30   : > { %s2195_s11 = scalar_select %p1909_p5, 1, 0 }
  0x31   : > { %p40_p3 = por %p39_p0, %p38_p12  ;;  %s258_s13 = sand.u32 1, %s1763_s26  }
  0x32   : > { %s1309_s15 = sshll.u32 %s258_s13, 6  ;;  %s1351_s14 = sshll.u32 %s1767_s27, 10 }
  0x33   : > { %s1922_s20 = scalar_lea.hbm %s2175_s0, %s1351_s14  ;;  %s262_s21 = scalar_lea.vmem [#allocation2], %s1309_s15 }
  0x34   : > { %s270_s22 = sshll.u32 %s262_s21, 4  ;;  %p1926_p2 = pnand %p1549_p10, %p40_p3  ;;  %s1924_s22 = int_to_ptr.vmem [resolvable:$true] %s270_s22 }
  0x35   : > { %s1930_s29 = scalar_lea.sflag [#allocation3], %s258_s13  ;;  %s1671_s16 = scalar_lea.hbm %s1922_s20, 1024 }
  0x36   : > { %p1672_p11 = scmp.ne.s32.totalorder %s1922_s20, %s1671_s16  ;;  %p1673_p7 = pneg %p1926_p2 }
  0x37   : > { %s1676_s15 = scalar_lea.hbm %s2175_s0, 2048  ;;  %p1677_p13 = scmp.lt.s32.totalorder %s1922_s20, %s2175_s0 }
  0x38   : > { %p1674_p9 = pnand %p1673_p7, %p1672_p11  ;;  %p1678_p0 = scmp.lt.s32.totalorder %s1676_s15, %s1671_s16 }
  0x3a   : > { %p1675_p12 = pneg %p1674_p9  ;;  %p1679_p10 = por %p1678_p0, %p1677_p13 }
  0x3c   : > { %p1680_p3 = pnand %p1679_p10, %p1675_p12 }
  0x3e   : > { %1683 = shalt.err (!%p1680_p3)
}
  0x3f   : > { %s1684_s13 = scalar_lea.vmem %s1924_s22, 1024  ;;  %s1773_s17 = smov [#allocation2]  }
  0x40   : > { %p1685_p1 = scmp.ne.s32.totalorder %s1924_s22, %s1684_s13  ;;  %s1689_s2 = sshll.u32 %s1773_s17, 4  ;;  %s1690_s2 = int_to_ptr.vmem [resolvable:$false] %s1689_s2 }
  0x41   : > { %s1691_s14 = scalar_lea.vmem %s1690_s2, 2048  ;;  %p1692_p9 = scmp.lt.s32.totalorder %s1924_s22, %s1690_s2 }
  0x42   : > { %p1687_p6 = pnand %p1685_p1, %p1673_p7  ;;  %p1693_p5 = scmp.lt.s32.totalorder %s1691_s14, %s1684_s13 }
  0x44   : > { %p1688_p11 = pneg %p1687_p6  ;;  %p1694_p4 = por %p1693_p5, %p1692_p9 }
  0x46   : > { %p1695_p8 = pnand %p1694_p4, %p1688_p11 }
  0x48   : > { %1698 = shalt.err (!%p1695_p8)
}
  0x49   : > { %s2197_s16 = smov 8   ;;  %s2198_s18 = smov 128  }
  0x4a   : > { %1542 = dma.hbm_to_vmem [thread:$0]  (!%p1926_p2), %s1922_s20, 1024, %s1924_s22, %s1930_s29, %s2198_s18, %s2198_s18, %s2197_s16  }
  0x4b   : > { %p2199_p1 = scmp.ne.s32.totalorder %s2192_s9, 0 }
  0x4c   : > { %s1957_s17 = sand.u32 (!%p2199_p1), 1, %s1759_s25   ;;  %p2200_p4 = scmp.ne.s32.totalorder (!%p2199_p1), %s2190_s30, 0 }
  0x4d   : > { %282 = sbr.rel (%p2199_p1) target bundleno = 1012 (0x3f4), region = 48  ;;  %s1314_s2 = sshll.u32 (!%p2199_p1), %s1957_s17, 6 }
  0x4e   : > { %s285_s15 = scalar_lea.sflag (!%p2199_p1), [#allocation3], %s1957_s17  ;;  %s1961_s19 = scalar_lea.vmem (!%p2199_p1), [#allocation2], %s1314_s2 }
  0x52   : > { %1742 = dma.done.wait (%p2200_p4), %s285_s15, 1024  }
  0x53   : > { %1744 = vsyncadd (%p2200_p4), %s285_s15, 4294966272  ;;  %p2201_p6 = scmp.eq.s32.totalorder %s1842_s28, 0 }
  0x55   : > { %1746 = dma.done.wait (%p2201_p6), [#allocation6], 2048   ;;  %p2202_p8 = pmov %p2201_p6 }
  0x56   : > { %v1774_v0 = vmov 0.0   ;;  %vm1775_vm0 = vmmov 0   ;;  %v344_v1 = vld [vmem:[#allocation5 + $0x38] sm:$0xff]  ;;  %v343_v3 = vld [vmem:[#allocation5 + $0x30] sm:$0xff]  ;;  %v342_v5 = vld [vmem:[#allocation5 + $0x28] sm:$0xff]  ;;  %vm484_vm1 = vcmask 1041409   ;;  %v569_v41 = vlaneseq }
  0x57   : > { %1748 = vsyncadd (%p2202_p8), [#allocation6], 4294965248  ;;  %1440 = vmatprep.subr.mxu1 %v1774_v0  ;;  %1456 = vmatprep.mubr.msk.f32.mxu1 %vm1775_vm0, %v1774_v0  ;;  %v482_v2 = vld [vmem:[%s2176_s1 + $0x38] sm:$0xff]  ;;  %v481_v4 = vld [vmem:[%s2176_s1 + $0x30] sm:$0xff]  ;;  %vm487_vm2 = vcmask 1042434   ;;  %vm490_vm3 = vcmask 1043459  }
  0x58   : > { %1412 = vmatprep.subr.mxu0 %v344_v1  ;;  %1441 = vmatpush3.msra.mxu1 %v482_v2  ;;  %v480_v6 = vld [vmem:[%s2176_s1 + $0x28] sm:$0xff]  ;;  %v341_v7 = vld [vmem:[#allocation5 + $0x20] sm:$0xff]  ;;  %v331_v10 = vld [vmem:[%s1961_s19 + $0x10] sm:$0xff]  ;;  %vm345_vm4 = vcmask 523264   ;;  %v1776_v39 = vmov 1966171168  }
  0x59   : > { %1413 = vmatpush3.msra.mxu0 %v344_v1  ;;  %1442 = vmatprep.subr.mxu1 %v1774_v0  ;;  %v479_v8 = vld [vmem:[%s2176_s1 + $0x20] sm:$0xff]  ;;  %v340_v11 = vld [vmem:[#allocation5 + $0x18] sm:$0xff]  ;;  %v483_v14 = vrot.slane %v331_v10, 7  ;;  %v335_v16 = vld [vmem:[%s1961_s19 + $0x30] sm:$0xff]  ;;  %v567_v40 = vunpack.c.l.s4 %v1776_v39  ;;  %v570_v43 = vshrl.u32 %v569_v41, 7  ;;  %s1777_s29 = smov 64  }
  0x5a   : > { %1414 = vmatprep.subr.mxu0 %v343_v3  ;;  %1443 = vmatpush3.msra.mxu1 %v481_v4  ;;  %v329_v9 = vld [vmem:[%s1961_s19] sm:$0xff]  ;;  %v478_v12 = vld [vmem:[%s2176_s1 + $0x18] sm:$0xff]  ;;  %v339_v17 = vld [vmem:[#allocation5 + $0x10] sm:$0xff]  ;;  %v489_v22 = vrot.slane %v335_v16, 5  ;;  %vm755_vm5 = vcmask 64512   ;;  %s1317_s18 = sshll.u32 %s1957_s17, 2 }
  0x5b   : > { %1415 = vmatpush3.msra.mxu0 %v343_v3  ;;  %1444 = vmatprep.subr.mxu1 %v1774_v0  ;;  %v333_v13 = vld [vmem:[%s1961_s19 + $0x20] sm:$0xff]  ;;  %v477_v18 = vld [vmem:[%s2176_s1 + $0x10] sm:$0xff]  ;;  %v485_v19 = vsel %vm484_vm1, %v483_v14, %v329_v9  ;;  %v338_v20 = vld [vmem:[#allocation5 + $0x8] sm:$0xff]  ;;  %v568_v42 = vunpack.c.0.s8 %v567_v40  ;;  %v592_v51 = vsub.s32 0, %v570_v43  ;;  %vm1193_vm6 = vcmask 516096   ;;  %s1352_s2 = sshll.u32 %s1842_s28, 6 }
  0x5c   : > { %1416 = vmatprep.subr.mxu0 %v342_v5  ;;  %1445 = vmatpush3.msra.mxu1 %v480_v6  ;;  %v486_v15 = vrot.slane %v333_v13, 6  ;;  %v476_v21 = vld [vmem:[%s2176_s1 + $0x8] sm:$0xff]  ;;  %v337_v24 = vld [vmem:[#allocation5] sm:$0xff]  ;;  %v625_v28 = vld [vmem:[%s2180_s5 + $0x38] sm:$0xff]  ;;  %s326_s15 = scalar_lea.vmem [#allocation8], %s1317_s18  ;;  %s2130_s30 = scalar_lea.hbm %s2182_s7, %s1352_s2 }
  0x5d   : > { %1417 = vmatpush3.msra.mxu0 %v342_v5  ;;  %1446 = vmatprep.subr.mxu1 %v1774_v0  ;;  %v475_v25 = vld [vmem:[%s2176_s1] sm:$0xff]  ;;  %v330_v27 = vld [vmem:[%s1961_s19 + $0x8] sm:$0xff]  ;;  %v624_v29 = vld [vmem:[%s2180_s5 + $0x30] sm:$0xff]  ;;  %v2049_v44 = vsub.s32 %v568_v42, %v570_v43  ;;  %s1212_s9 = sshll.u32 %s326_s15, 4  ;;  %s1199_s28 = scalar_lea.sflag [#allocation4], %s1957_s17  ;;  %s2132_s9 = int_to_ptr.vmem [resolvable:$true] %s1212_s9 }
  0x5e   : > { %1418 = vmatprep.subr.mxu0 %v341_v7  ;;  %1447 = vmatpush3.msra.mxu1 %v479_v8  ;;  %v488_v23 = vsel %vm487_vm2, %v486_v15, %v485_v19  ;;  %v332_v30 = vld [vmem:[%s1961_s19 + $0x18] sm:$0xff]  ;;  %v623_v31 = vld [vmem:[%s2180_s5 + $0x28] sm:$0xff]  ;;  %v622_v34 = vld [vmem:[%s2180_s5 + $0x20] sm:$0xff]  ;;  %s1699_s22 = scalar_lea.vmem %s2132_s9, 64  ;;  %p2203_p2 = scmp.ne.s32.totalorder %s2195_s11, 0 }
  0x5f   : > { %1419 = vmatpush3.msra.mxu0 %v341_v7  ;;  %1448 = vmatprep.subr.mxu1 %v1774_v0  ;;  %v491_v26 = vsel %vm490_vm3, %v489_v22, %v488_v23  ;;  %v334_v32 = vld [vmem:[%s1961_s19 + $0x28] sm:$0xff]  ;;  %v336_v33 = vld [vmem:[%s1961_s19 + $0x38] sm:$0xff]  ;;  %v620_v36 = vld [vmem:[%s2180_s5 + $0x10] sm:$0xff]  ;;  %p1700_p5 = scmp.ne.s32.totalorder %s2132_s9, %s1699_s22  ;;  %s1778_s10 = smov [#allocation8]  }
  0x60   : > { %1420 = vmatprep.subr.mxu0 %v340_v11  ;;  %1449 = vmatpush3.msra.mxu1 %v478_v12  ;;  %v621_v35 = vld [vmem:[%s2180_s5 + $0x18] sm:$0xff]  ;;  %v619_v37 = vld [vmem:[%s2180_s5 + $0x8] sm:$0xff]  ;;  %v618_v38 = vld [vmem:[%s2180_s5] sm:$0xff] }
  0x61   : > { %1421 = vmatpush3.msra.mxu0 %v340_v11  ;;  %1450 = vmatprep.subr.mxu1 %v1774_v0  ;;  %v864_v12 = vld [vmem:[%s2181_s6] sm:$0xff]  ;;  %p1701_p7 = pnand %p1700_p5, %p2203_p2 }
  0x62   : > { %1422 = vmatprep.subr.mxu0 %v339_v17  ;;  %1451 = vmatpush3.msra.mxu1 %v477_v18 }
  0x63   : > { %1423 = vmatpush3.msra.mxu0 %v339_v17  ;;  %1452 = vmatprep.subr.mxu1 %v1774_v0  ;;  %p1702_p12 = pneg %p1701_p7 }
  0x64   : > { %1424 = vmatprep.subr.mxu0 %v338_v20  ;;  %1453 = vmatpush3.msra.mxu1 %v476_v21 }
  0x65   : > { %1425 = vmatpush3.msra.mxu0 %v338_v20  ;;  %1454 = vmatprep.subr.mxu1 %v1774_v0 }
  0x66   : > { %1426 = vmatprep.subr.mxu0 %v337_v24  ;;  %1455 = vmatpush3.msra.mxu1 %v475_v25 }
  0x67   : > { %1427 = vmatpush3.msra.mxu0 %v337_v24  ;;  %1428 = vmatprep.mubr.msk.f32.mxu0 %vm345_vm4, %v329_v9 }
  0x68   : > { %1457 = vmatmul.mubr.msk.f32.vlgmr.msra.gmra.mxu1 %vm345_vm4, %v491_v26  ;;  %1429 = vmatmul.mubr.msk.f32.vlgmr.msra.gmra.mxu0 %vm345_vm4, %v330_v27 }
  0x69   : > { %1431 = vmatprep.mubr.msk.f32.mxu0 %vm345_vm4, %v331_v10  ;;  %1459 = vmatprep.subr.mxu0 %v625_v28 }
  0x6a   : > { %1460 = vmatpush3.msra.mxu0 %v625_v28  ;;  %1487 = vmatprep.subr.mxu1 %v864_v12 }
  0x6b   : > { %1461 = vmatprep.subr.mxu0 %v624_v29  ;;  %1488 = vmatpush3.msra.mxu1 %v864_v12 }
  0x6c   : > { %1432 = vmatmul.mubr.msk.f32.gmra.mxu0 %vm345_vm4, %v332_v30  ;;  %1501 = vmatprep.subr.mxu1 %v1774_v0 }
  0x6d   : > { %1434 = vmatprep.mubr.msk.f32.mxu0 %vm345_vm4, %v333_v13  ;;  %1462 = vmatpush3.msra.mxu0 %v624_v29 }
  0x6e   : > { %1463 = vmatprep.subr.mxu0 %v623_v31 }
  0x6f   : > { %1464 = vmatpush3.msra.mxu0 %v623_v31 }
  0x70   : > { %1435 = vmatmul.mubr.msk.f32.gmra.mxu0 %vm345_vm4, %v334_v32  ;;  %1465 = vmatprep.subr.mxu0 %v622_v34 }
  0x71   : > { %1437 = vmatprep.mubr.msk.f32.mxu0 %vm345_vm4, %v335_v16  ;;  %1466 = vmatpush3.msra.mxu0 %v622_v34 }
  0x72   : > { %1467 = vmatprep.subr.mxu0 %v621_v35 }
  0x73   : > { %1468 = vmatpush3.msra.mxu0 %v621_v35 }
  0x74   : > { %1438 = vmatmul.mubr.msk.f32.gmra.mxu0 %vm345_vm4, %v336_v33  ;;  %1469 = vmatprep.subr.mxu0 %v620_v36 }
  0x75   : > { %1470 = vmatpush3.msra.mxu0 %v620_v36 }
  0x76   : > { %1471 = vmatprep.subr.mxu0 %v619_v37 }
  0x77   : > { %1472 = vmatpush3.msra.mxu0 %v619_v37 }
  0x78   : > { %1473 = vmatprep.subr.mxu0 %v618_v38 }
  0x79   : > { %1474 = vmatpush3.msra.mxu0 %v618_v38 }
 0x128   : > { %v560_v45 = vpop.f32.mrf.mxu1  ;;  %v1430_v46 = vpop.f32.mrf.mxu0 }
 0x129   : > { %v564_v47 = vmul.f32 0.35355338, %v560_v45  ;;  %1004 = vrot.lane.b32.xlu0 %v1430_v46, %s1777_s29 }
 0x12a   : > { %v1458_v48 = vpop.f32.mrf.mxu1  ;;  %v436_v49 = vpop.f32.mrf.mxu0 }
 0x12b   : > { %v572_v50 = vrot.slane %v564_v47, %v2049_v44 }
 0x12c   : > { %v1433_v52 = vpop.f32.mrf.mxu0 }
 0x12d   : > { %v573_v53 = vcombine.high %v572_v50, %v572_v50  ;;  %v580_v54 = vrot.slane %v572_v50, %v2049_v44  ;;  %1002 = vrot.lane.b32.xlu0 %v436_v49, %s1777_s29  ;;  %1008 = vrot.lane.b32.xlu1 %v1433_v52, %s1777_s29 }
 0x12e   : > { %v446_v55 = vpop.f32.mrf.mxu0 }
 0x12f   : > { %v593_v56 = vrot.slane %v580_v54, %v592_v51  ;;  %v587_v57 = vrot.slane %v573_v53, %v2049_v44  ;;  %v588_v58 = vcombine.high %v580_v54, %v580_v54 }
 0x130   : > { %v1436_v59 = vpop.f32.mrf.mxu0 }
 0x131   : > { %v611_v60 = vmul.f32 %v1430_v46, %v593_v56  ;;  %v610_v61 = vmul.f32 %v593_v56, %v436_v49  ;;  %v597_v62 = vrot.slane %v587_v57, %v592_v51  ;;  %1006 = vrot.lane.b32.xlu1 %v446_v55, %s1777_s29  ;;  %v601_v2 = vrot.slane %v588_v58, %v592_v51 }
 0x132   : > { %v456_v63 = vpop.f32.mrf.mxu0  ;;  %v589_v4 = vcombine.high %v587_v57, %v587_v57 }
 0x133   : > { %v612_v1 = vmul.f32 %v597_v62, %v446_v55  ;;  %1475 = vmatprep.mubr.msk.f32.mxu0 %vm345_vm4, %v610_v61  ;;  %1010 = vrot.lane.b32.xlu0 %v456_v63, %s1777_s29  ;;  %v613_v5 = vmul.f32 %v1433_v52, %v597_v62  ;;  %v614_v6 = vmul.f32 %v601_v2, %v456_v63 }
 0x134   : > { %1476 = vmatmul.mubr.msk.f32.vlgmr.msra.gmra.mxu0 %vm345_vm4, %v611_v60  ;;  %v1439_v3 = vpop.f32.mrf.mxu0  ;;  %v605_v8 = vrot.slane %v589_v4, %v592_v51  ;;  %v615_v9 = vmul.f32 %v1436_v59, %v601_v2 }
 0x135   : > { %1478 = vmatprep.mubr.msk.f32.mxu0 %vm345_vm4, %v612_v1  ;;  %1012 = vrot.lane.b32.xlu1 %v1436_v59, %s1777_s29 }
 0x136   : > { %v466_v7 = vpop.f32.mrf.mxu0  ;;  %v617_v11 = vmul.f32 %v1439_v3, %v605_v8 }
 0x137   : > { %1014 = vrot.lane.b32.xlu0 %v466_v7, %s1777_s29  ;;  %v616_v10 = vmul.f32 %v605_v8, %v466_v7 }
 0x138   : > { %1479 = vmatmul.mubr.msk.f32.gmra.mxu0 %vm345_vm4, %v613_v5 }
 0x139   : > { %1481 = vmatprep.mubr.msk.f32.mxu0 %vm345_vm4, %v614_v6  ;;  %1016 = vrot.lane.b32.xlu1 %v1439_v3, %s1777_s29  ;;  %s1703_s29 = sshll.u32 %s1778_s10, 4  ;;  %s1704_s29 = int_to_ptr.vmem [resolvable:$false] %s1703_s29 }
 0x13a   : > { %s1705_s21 = scalar_lea.vmem %s1704_s29, 128  ;;  %p1706_p13 = scmp.lt.s32.totalorder %s2132_s9, %s1704_s29 }
 0x13b   : > { %p1707_p0 = scmp.lt.s32.totalorder %s1705_s21, %s1699_s22 }
 0x13c   : > { %1482 = vmatmul.mubr.msk.f32.gmra.mxu0 %vm345_vm4, %v615_v9 }
 0x13d   : > { %1484 = vmatprep.mubr.msk.f32.mxu0 %vm345_vm4, %v616_v10  ;;  %p1708_p10 = por %p1707_p0, %p1706_p13 }
 0x13f   : > { %p1709_p3 = pnand %p1708_p10, %p1702_p12 }
 0x140   : > { %1485 = vmatmul.mubr.msk.f32.gmra.mxu0 %vm345_vm4, %v617_v11 }
 0x1f4   : > { %v1477_v13 = vpop.f32.mrf.mxu0 }
 0x1f5   : > { %v757_v15 = vsel %vm755_vm5, %v1477_v13, -inf }
 0x1f6   : > { %v716_v14 = vpop.f32.mrf.mxu0 }
 0x1f7   : > { %v756_v16 = vsel %vm755_vm5, %v716_v14, -inf }
 0x1f8   : > { %v758_v17 = vmax.f32 %v756_v16, %v757_v15  ;;  %v1480_v18 = vpop.f32.mrf.mxu0 }
 0x1f9   : > { %v766_v21 = vsel %vm755_vm5, %v1480_v18, -inf }
 0x1fa   : > { %v759_v19 = vrot.slane %v758_v17, 4  ;;  %v726_v20 = vpop.f32.mrf.mxu0 }
 0x1fb   : > { %v765_v22 = vsel %vm755_vm5, %v726_v20, -inf }
 0x1fc   : > { %v760_v23 = vmax.f32 %v758_v17, %v759_v19  ;;  %v767_v24 = vmax.f32 %v765_v22, %v766_v21  ;;  %v1483_v25 = vpop.f32.mrf.mxu0 }
 0x1fd   : > { %v775_v29 = vsel %vm755_vm5, %v1483_v25, -inf }
 0x1fe   : > { %v761_v26 = vrot.slane %v760_v23, 2  ;;  %v768_v27 = vrot.slane %v767_v24, 4  ;;  %v736_v28 = vpop.f32.mrf.mxu0 }
 0x1ff   : > { %v774_v30 = vsel %vm755_vm5, %v736_v28, -inf }
 0x200   : > { %v762_v31 = vmax.f32 %v760_v23, %v761_v26  ;;  %v769_v32 = vmax.f32 %v767_v24, %v768_v27  ;;  %v776_v33 = vmax.f32 %v774_v30, %v775_v29  ;;  %v1486_v34 = vpop.f32.mrf.mxu0 }
 0x201   : > { %v784_v39 = vsel %vm755_vm5, %v1486_v34, -inf }
 0x202   : > { %v763_v35 = vrot.slane %v762_v31, 1  ;;  %v770_v36 = vrot.slane %v769_v32, 2  ;;  %v777_v37 = vrot.slane %v776_v33, 4  ;;  %v746_v38 = vpop.f32.mrf.mxu0 }
 0x203   : > { %v783_v40 = vsel %vm755_vm5, %v746_v38, -inf }
 0x204   : > { %v764_v41 = vmax.f32 %v762_v31, %v763_v35  ;;  %v771_v42 = vmax.f32 %v769_v32, %v770_v36  ;;  %v778_v43 = vmax.f32 %v776_v33, %v777_v37  ;;  %v785_v45 = vmax.f32 %v783_v40, %v784_v39 }
 0x206   : > { %v792_v46 = vsub.f32 %v716_v14, %v764_v41  ;;  %v793_v47 = vsub.f32 %v1477_v13, %v764_v41  ;;  %v772_v48 = vrot.slane %v771_v42, 1  ;;  %v779_v49 = vrot.slane %v778_v43, 2 }
 0x207   : > { %v786_v50 = vrot.slane %v785_v45, 4 }
 0x208   : > { %v800_v51 = vmul.f32 1.442695, %v792_v46  ;;  %v802_v52 = vmul.f32 1.442695, %v793_v47  ;;  %v773_v53 = vmax.f32 %v771_v42, %v772_v48  ;;  %v780_v54 = vmax.f32 %v778_v43, %v779_v49 }
 0x209   : > { %v787_v55 = vmax.f32 %v785_v45, %v786_v50 }
 0x20a   : > { %1595 = vpow2.f32 %v800_v51  ;;  %v794_v56 = vsub.f32 %v726_v20, %v773_v53  ;;  %v795_v57 = vsub.f32 %v1480_v18, %v773_v53  ;;  %v781_v58 = vrot.slane %v780_v54, 1 }
 0x20b   : > { %1597 = vpow2.f32 %v802_v52  ;;  %v788_v59 = vrot.slane %v787_v55, 2 }
 0x20c   : > { %v804_v60 = vmul.f32 1.442695, %v794_v56  ;;  %v806_v61 = vmul.f32 1.442695, %v795_v57  ;;  %v782_v62 = vmax.f32 %v780_v54, %v781_v58 }
 0x20d   : > { %v789_v63 = vmax.f32 %v787_v55, %v788_v59 }
 0x20e   : > { %1599 = vpow2.f32 %v804_v60  ;;  %v796_v1 = vsub.f32 %v736_v28, %v782_v62  ;;  %v797_v2 = vsub.f32 %v1483_v25, %v782_v62 }
 0x20f   : > { %1601 = vpow2.f32 %v806_v61  ;;  %v790_v3 = vrot.slane %v789_v63, 1 }
 0x210   : > { %v808_v4 = vmul.f32 1.442695, %v796_v1  ;;  %v810_v5 = vmul.f32 1.442695, %v797_v2 }
 0x211   : > { %v791_v6 = vmax.f32 %v789_v63, %v790_v3 }
 0x212   : > { %1603 = vpow2.f32 %v808_v4 }
 0x213   : > { %1605 = vpow2.f32 %v810_v5  ;;  %v798_v7 = vsub.f32 %v746_v38, %v791_v6  ;;  %v799_v8 = vsub.f32 %v1486_v34, %v791_v6  ;;  %v1077_v5 = vld [vmem:[#allocation7 + $0x38] sm:$0xff]  ;;  %v1076_v6 = vld [vmem:[#allocation7 + $0x30] sm:$0xff] }
 0x215   : > { %v812_v9 = vmul.f32 1.442695, %v798_v7  ;;  %v814_v10 = vmul.f32 1.442695, %v799_v8  ;;  %v1075_v7 = vld [vmem:[#allocation7 + $0x28] sm:$0xff]  ;;  %v1074_v8 = vld [vmem:[#allocation7 + $0x20] sm:$0xff] }
 0x217   : > { %v1596_v11 = vpop.eup %1595  ;;  %1607 = vpow2.f32 %v812_v9  ;;  %v1073_v9 = vld [vmem:[#allocation7 + $0x18] sm:$0xff] }
 0x218   : > { %v1598_v12 = vpop.eup %1597  ;;  %v816_v13 = vsel %vm755_vm5, %v1596_v11, 0.0  ;;  %1609 = vpow2.f32 %v814_v10  ;;  %v1072_v10 = vld [vmem:[#allocation7 + $0x10] sm:$0xff] }
 0x219   : > { %v817_v14 = vsel %vm755_vm5, %v1598_v12, 0.0 }
 0x21a   : > { %v818_v15 = vadd.f32 %v817_v14, %v816_v13  ;;  %v1005_v13 = vpop.permute.xlu0 %1004  ;;  %v1009_v14 = vpop.permute.xlu1 %1008 }
 0x21b   : > { %v1600_v16 = vpop.eup %1599 }
 0x21c   : > { %v1602_v17 = vpop.eup %1601  ;;  %v819_v18 = vrot.slane %v818_v15, 4  ;;  %v825_v19 = vsel %vm755_vm5, %v1600_v16, 0.0 }
 0x21d   : > { %v826_v20 = vsel %vm755_vm5, %v1602_v17, 0.0 }
 0x21e   : > { %v820_v21 = vadd.f32 %v819_v18, %v818_v15  ;;  %v827_v22 = vadd.f32 %v826_v20, %v825_v19  ;;  %v1007_v18 = vpop.permute.xlu1 %1006 }
 0x21f   : > { %v1604_v23 = vpop.eup %1603 }
 0x220   : > { %v1606_v24 = vpop.eup %1605  ;;  %v821_v25 = vrot.slane %v820_v21, 2  ;;  %v828_v26 = vrot.slane %v827_v22, 4  ;;  %v834_v27 = vsel %vm755_vm5, %v1604_v23, 0.0 }
 0x221   : > { %v835_v28 = vsel %vm755_vm5, %v1606_v24, 0.0 }
 0x222   : > { %v822_v29 = vadd.f32 %v821_v25, %v820_v21  ;;  %v829_v30 = vadd.f32 %v828_v26, %v827_v22  ;;  %v836_v31 = vadd.f32 %v835_v28, %v834_v27  ;;  %v1013_v28 = vpop.permute.xlu1 %1012 }
 0x224   : > { %v1608_v32 = vpop.eup %1607  ;;  %v823_v33 = vrot.slane %v822_v29, 1  ;;  %v830_v34 = vrot.slane %v829_v30, 2  ;;  %v837_v35 = vrot.slane %v836_v31, 4 }
 0x225   : > { %v1610_v36 = vpop.eup %1609  ;;  %v843_v37 = vsel %vm755_vm5, %v1608_v32, 0.0 }
 0x226   : > { %v831_v38 = vadd.f32 %v830_v34, %v829_v30  ;;  %v838_v39 = vadd.f32 %v837_v35, %v836_v31  ;;  %v844_v40 = vsel %vm755_vm5, %v1610_v36, 0.0  ;;  %v824_v41 = vadd.f32 %v823_v33, %v822_v29 }
 0x227   : > { %v845_v42 = vadd.f32 %v844_v40, %v843_v37 }
 0x228   : > { %v832_v43 = vrot.slane %v831_v38, 1  ;;  %v839_v45 = vrot.slane %v838_v39, 2  ;;  %1611 = vrcp.f32 %v824_v41  ;;  %v1017_v41 = vpop.permute.xlu1 %1016 }
 0x229   : > { %v846_v46 = vrot.slane %v845_v42, 4 }
 0x22a   : > { %v840_v47 = vadd.f32 %v839_v45, %v838_v39  ;;  %v833_v48 = vadd.f32 %v832_v43, %v831_v38 }
 0x22b   : > { %v847_v49 = vadd.f32 %v846_v46, %v845_v42 }
 0x22c   : > { %v841_v50 = vrot.slane %v840_v47, 1  ;;  %1613 = vrcp.f32 %v833_v48 }
 0x22d   : > { %v848_v51 = vrot.slane %v847_v49, 2 }
 0x22e   : > { %v842_v52 = vadd.f32 %v841_v50, %v840_v47 }
 0x22f   : > { %v849_v53 = vadd.f32 %v848_v51, %v847_v49 }
 0x230   : > { %1615 = vrcp.f32 %v842_v52 }
 0x231   : > { %v850_v54 = vrot.slane %v849_v53, 1 }
 0x233   : > { %v851_v55 = vadd.f32 %v850_v54, %v849_v53 }
 0x235   : > { %v1612_v56 = vpop.eup %1611  ;;  %1617 = vrcp.f32 %v851_v55 }
 0x236   : > { %v853_v57 = vmul.f32 %v1612_v56, %v1596_v11  ;;  %v854_v58 = vmul.f32 %v1612_v56, %v1598_v12  ;;  %v1071_v11 = vld [vmem:[#allocation7 + $0x8] sm:$0xff]  ;;  %v1070_v12 = vld [vmem:[#allocation7] sm:$0xff] }
 0x238   : > { %1489 = vmatprep.mubr.msk.f32.mxu1 %vm755_vm5, %v853_v57 }
 0x239   : > { %v1614_v59 = vpop.eup %1613  ;;  %1490 = vmatmul.mubr.msk.f32.vlgmr.msra.gmra.mxu1 %vm755_vm5, %v854_v58 }
 0x23a   : > { %v856_v60 = vmul.f32 %v1614_v59, %v1600_v16  ;;  %v857_v61 = vmul.f32 %v1614_v59, %v1602_v17  ;;  %1502 = vmatpush3.msra.mxu1 %v1077_v5  ;;  %v1003_v16 = vpop.permute.xlu0 %1002 }
 0x23b   : > { %1503 = vmatprep.subr.mxu1 %v1774_v0 }
 0x23c   : > { %1492 = vmatprep.mubr.msk.f32.mxu1 %vm755_vm5, %v856_v60  ;;  %1504 = vmatpush3.msra.mxu1 %v1076_v6 }
 0x23d   : > { %v1616_v62 = vpop.eup %1615  ;;  %1493 = vmatmul.mubr.msk.f32.gmra.mxu1 %vm755_vm5, %v857_v61  ;;  %1505 = vmatprep.subr.mxu1 %v1774_v0 }
 0x23e   : > { %v859_v63 = vmul.f32 %v1616_v62, %v1604_v23  ;;  %v860_v1 = vmul.f32 %v1616_v62, %v1606_v24  ;;  %1506 = vmatpush3.msra.mxu1 %v1075_v7 }
 0x23f   : > { %1507 = vmatprep.subr.mxu1 %v1774_v0 }
 0x240   : > { %1495 = vmatprep.mubr.msk.f32.mxu1 %vm755_vm5, %v859_v63  ;;  %1508 = vmatpush3.msra.mxu1 %v1074_v8 }
 0x241   : > { %1496 = vmatmul.mubr.msk.f32.gmra.mxu1 %vm755_vm5, %v860_v1  ;;  %1509 = vmatprep.subr.mxu1 %v1774_v0 }
 0x242   : > { %v1618_v2 = vpop.eup %1617  ;;  %1510 = vmatpush3.msra.mxu1 %v1073_v9 }
 0x243   : > { %v862_v3 = vmul.f32 %v1618_v2, %v1608_v32  ;;  %v863_v4 = vmul.f32 %v1618_v2, %v1610_v36  ;;  %1511 = vmatprep.subr.mxu1 %v1774_v0  ;;  %v1011_v32 = vpop.permute.xlu0 %1010 }
 0x244   : > { %1512 = vmatpush3.msra.mxu1 %v1072_v10 }
 0x245   : > { %1498 = vmatprep.mubr.msk.f32.mxu1 %vm755_vm5, %v862_v3  ;;  %1513 = vmatprep.subr.mxu1 %v1774_v0 }
 0x246   : > { %1499 = vmatmul.mubr.msk.f32.gmra.mxu1 %vm755_vm5, %v863_v4 }
 0x247   : > { %1517 = vmatprep.mubr.msk.f32.mxu1 %vm1775_vm0, %v1774_v0  ;;  %1514 = vmatpush3.msra.mxu1 %v1071_v11  ;;  %v1015_v48 = vpop.permute.xlu0 %1014 }
 0x248   : > { %1515 = vmatprep.subr.mxu1 %v1774_v0 }
 0x249   : > { %1516 = vmatpush3.msra.mxu1 %v1070_v12 }
 0x2f9   : > { %v1491_v15 = vpop.f32.mrf.mxu1 }
 0x2fa   : > { %v1027_v17 = vmul.f32 %v1491_v15, %v1005_v13  ;;  %v1343_v13 = vld [vmem:[%s2179_s4] ss:$0 sm:$0xff] }
 0x2fb   : > { %v955_v19 = vpop.f32.mrf.mxu1 }
 0x2fc   : > { %v1026_v20 = vmul.f32 %v1003_v16, %v955_v19  ;;  %v1035_v22 = vsel %vm345_vm4, %v1027_v17, 0.0 }
 0x2fd   : > { %v1494_v21 = vpop.f32.mrf.mxu1 }
 0x2fe   : > { %v1034_v23 = vsel %vm345_vm4, %v1026_v20, 0.0  ;;  %v1029_v24 = vmul.f32 %v1494_v21, %v1009_v14 }
 0x2ff   : > { %v1036_v25 = vadd.f32 %v1035_v22, %v1034_v23  ;;  %v965_v26 = vpop.f32.mrf.mxu1 }
 0x300   : > { %v1028_v27 = vmul.f32 %v1007_v18, %v965_v26  ;;  %v1044_v29 = vsel %vm345_vm4, %v1029_v24, 0.0 }
 0x301   : > { %v1497_v0 = vpop.f32.mrf.mxu1  ;;  %v1037_v33 = vrot.slane %v1036_v25, 4 }
 0x302   : > { %v1043_v30 = vsel %vm345_vm4, %v1028_v27, 0.0  ;;  %v1031_v31 = vmul.f32 %v1497_v0, %v1013_v28 }
 0x303   : > { %v1045_v34 = vadd.f32 %v1044_v29, %v1043_v30  ;;  %v975_v35 = vpop.f32.mrf.mxu1  ;;  %v1038_v42 = vadd.f32 %v1037_v33, %v1036_v25 }
 0x304   : > { %v1030_v36 = vmul.f32 %v1011_v32, %v975_v35  ;;  %v1053_v38 = vsel %vm345_vm4, %v1031_v31, 0.0 }
 0x305   : > { %v1046_v37 = vrot.slane %v1045_v34, 4  ;;  %v1039_v52 = vrot.slane %v1038_v42, 2 }
 0x306   : > { %v1052_v39 = vsel %vm345_vm4, %v1030_v36, 0.0  ;;  %v1500_v40 = vpop.f32.mrf.mxu1 }
 0x307   : > { %v1047_v43 = vadd.f32 %v1046_v37, %v1045_v34  ;;  %v1054_v45 = vadd.f32 %v1053_v38, %v1052_v39  ;;  %v1033_v46 = vmul.f32 %v1500_v40, %v1017_v41  ;;  %v1040_v59 = vadd.f32 %v1039_v52, %v1038_v42 }
 0x308   : > { %v985_v47 = vpop.f32.mrf.mxu1 }
 0x309   : > { %v1048_v49 = vrot.slane %v1047_v43, 2  ;;  %v1055_v50 = vrot.slane %v1054_v45, 4  ;;  %v1032_v51 = vmul.f32 %v1015_v48, %v985_v47  ;;  %v1062_v54 = vsel %vm345_vm4, %v1033_v46, 0.0 }
 0x30a   : > { %v1041_v2 = vrot.slane %v1040_v59, 1 }
 0x30b   : > { %v1056_v53 = vadd.f32 %v1055_v50, %v1054_v45  ;;  %v1061_v55 = vsel %vm345_vm4, %v1032_v51, 0.0  ;;  %v1049_v56 = vadd.f32 %v1048_v49, %v1047_v43 }
 0x30c   : > { %v1063_v58 = vadd.f32 %v1062_v54, %v1061_v55  ;;  %v1042_v7 = vadd.f32 %v1041_v2, %v1040_v59 }
 0x30d   : > { %v1057_v57 = vrot.slane %v1056_v53, 2  ;;  %v1050_v62 = vrot.slane %v1049_v56, 1 }
 0x30e   : > { %v1064_v61 = vrot.slane %v1063_v58, 4 }
 0x30f   : > { %v1058_v60 = vadd.f32 %v1057_v57, %v1056_v53  ;;  %v1051_v4 = vadd.f32 %v1050_v62, %v1049_v56 }
 0x310   : > { %v1065_v63 = vadd.f32 %v1064_v61, %v1063_v58 }
 0x311   : > { %v1059_v1 = vrot.slane %v1058_v60, 1  ;;  %v1089_v10 = vsel %vm484_vm1, %v1051_v4, %v1042_v7 }
 0x312   : > { %v1066_v3 = vrot.slane %v1065_v63, 2 }
 0x313   : > { %v1060_v6 = vadd.f32 %v1059_v1, %v1058_v60 }
 0x314   : > { %v1067_v5 = vadd.f32 %v1066_v3, %v1065_v63 }
 0x315   : > { %v1090_v11 = vsel %vm487_vm2, %v1060_v6, %v1089_v10 }
 0x316   : > { %v1068_v8 = vrot.slane %v1067_v5, 1 }
 0x318   : > { %v1069_v9 = vadd.f32 %v1068_v8, %v1067_v5 }
 0x31a   : > { %v1091_v12 = vsel %vm490_vm3, %v1069_v9, %v1090_v11 }
 0x31b   : > { %1518 = vmatmul.mubr.msk.f32.vlgmr.msra.gmra.mxu1 %vm345_vm4, %v1091_v12 }
 0x3db   : > { %v1160_v14 = vpop.f32.mrf.mxu1 }
 0x3dc   : > { %v1161_v15 = vadd.f32 %v1343_v13, %v1160_v14 }
 0x3dd   : > { %v1519_v16 = vpop.f32.mrf.mxu1 }
 0x3de   : > { %v1171_v17 = vrot.slane %v1161_v15, %v2049_v44 }
 0x3e0   : > { %v1172_v18 = vcombine.high %v1171_v17, %v1171_v17  ;;  %v1179_v19 = vrot.slane %v1171_v17, %v2049_v44 }
 0x3e2   : > { %v1186_v20 = vrot.slane %v1172_v18, %v2049_v44  ;;  %v1187_v21 = vcombine.high %v1179_v19, %v1179_v19  ;;  %1194 = vst.msk [vmem:[%s326_s15] sm:$0x1] %vm1193_vm6, %v1179_v19 }
 0x3e4   : > { %v1188_v22 = vcombine.high %v1186_v20, %v1186_v20  ;;  %1195 = vst.msk [vmem:[%s326_s15 + $0x1] sm:$0x1] %vm1193_vm6, %v1186_v20  ;;  %1196 = vst.msk [vmem:[%s326_s15 + $0x2] sm:$0x1] %vm1193_vm6, %v1187_v21 }
 0x3e6   : > { %1197 = vst.msk [vmem:[%s326_s15 + $0x3] sm:$0x1] %vm1193_vm6, %v1188_v22 }
 0x3e7   : > { %1712 = shalt.err (!%p1709_p3)
}
 0x3e8   : > { %s1713_s13 = scalar_lea.hbm %s2130_s30, 64  ;;  %s1717_s18 = scalar_lea.hbm %s2182_s7, 128 }
 0x3e9   : > { %p1714_p11 = scmp.ne.s32.totalorder %s2130_s30, %s1713_s13  ;;  %p1718_p4 = scmp.lt.s32.totalorder %s2130_s30, %s2182_s7 }
 0x3ea   : > { %p1719_p6 = scmp.lt.s32.totalorder %s1717_s18, %s1713_s13 }
 0x3eb   : > { %p1715_p9 = pnand %p1714_p11, %p2203_p2 }
 0x3ec   : > { %p1720_p8 = por %p1719_p6, %p1718_p4 }
 0x3ed   : > { %p1716_p1 = pneg %p1715_p9 }
 0x3ef   : > { %p1721_p5 = pnand %p1720_p8, %p1716_p1 }
 0x3f1   : > { %1724 = shalt.err (!%p1721_p5)
}
 0x3f2   : > { %s1779_s20 = smov 16   ;;  %s1780_s19 = smov 1  }
 0x3f3   : > { %1530 = dma.vmem_to_hbm [thread:$0]  (%p2203_p2), %s2132_s9, 64, %s2130_s30, %s1199_s28, %s1779_s20, %s1779_s20, %s1780_s19  }
 0x3f4 PF: > { %s1227_s22 = sand.u32 1, %s1755_s24   ;;  %p2204_p7 = scmp.ne.s32.totalorder %s2191_s8, 0 }
 0x3f5   : > { %p2205_p12 = scmp.ge.s32.totalorder %s1767_s27, 2  ;;  %s1228_s10 = scalar_lea.sflag [#allocation4], %s1227_s22 }
 0x3f7   : > { %p1544_p13 = pnand %p2205_p12, %p2204_p7 }
 0x3f9   : > { %p1545_p0 = pneg %p1544_p13 }
 0x3fb   : > { %1750 = dma.done.wait (%p1545_p0), %s1228_s10, 64  }
 0x3fc   : > { %1752 = vsyncadd (%p1545_p0), %s1228_s10, 4294967232  ;;  %p21_p10 = scmp.ge.s32.totalorder %s1899_s23, 4   ;;  %s2206_s24 = smov %s1759_s25 }
 0x3fd   : > { %s2207_s25 = smov %s1763_s26  ;;  %s2208_s26 = smov %s1915_s12 }
 0x3fe   : > { %s2209_s27 = smov %s1899_s23  ;;  %23 = sbr.rel (!%p21_p10) target bundleno = 8 (0x8), region = 101 }
 0x403   :  { %1233 = vsyncpa [#allocation3], 1 }
 0x404   :  { %1235 = vsyncpa [#allocation3 + $0x1], 1 }
 0x405   :  { %1236 = vsyncpa [#allocation6], 1 }
 0x406   :  { %1237 = vsyncpa [#allocation4], 1 }
 0x407   :  { %1239 = vsyncpa [#allocation4 + $0x1], 1 }

</bundles_post_ra>
